<compile_context>
chip_gen: v6e
topology: v6e:2x2x1
jax: 0.10.0
libtpu: 0.0.40
codegen_flags: <defaults>
</compile_context>

<pallas_src>
import math
import numpy as np

import jax
import jax.numpy as jnp
from jax.experimental import pallas as pl
from jax.experimental.pallas import tpu as pltpu


# ----------------------------------------------------------------------------
# Tiling helper (n_pad / bs / VMEM-budget aware)
# ----------------------------------------------------------------------------
def _pick_hw_tile(hw_pad, n_pad, bs, budget_bytes=12 << 20):
    """Largest lane-dense (multiple-of-128) tile of the padded H*W axis that
    divides it and keeps the per-step VMEM footprint under `budget_bytes`.

    Footprint per lane-column per step (bytes):
      out double-buffer (2x) + ~4 live (n_pad, tile) f32 temporaries
      + pred/ref input blocks (8 sublanes each, double-buffered).
    """
    per_col = n_pad * 4 * (2 + 4) + 4 * 8 * 4 * 2        # n_pad*24 + 256
    limit = max(128, budget_bytes // per_col)
    limit = min(limit, 32768)                             # sane upper cap
    if bs == 1 and hw_pad >= 256:
        limit = min(limit, hw_pad // 2)                   # >=2 blocks for 2 TCs (v7x)
    best = 128
    for m in range(hw_pad // 128, 0, -1):
        t = m * 128
        if t <= limit and hw_pad % t == 0:
            best = t
            break
    return best, per_col


# ----------------------------------------------------------------------------
# Fused Pallas kernel: bbox decode + IoU vs every GT box
# ----------------------------------------------------------------------------
def _fused_decode_iou(pred_flat, ref_grid, gt_derived, scale):
    """pred_flat:  (bs, 4, HW_pad) raw head output (lane-dense, zero-padded HW).
    ref_grid:   (4, HW_pad) stacked reference grid [xs, ys, xs, ys].
    gt_derived: (bs, n_pad, 8) precomputed [minx, miny, maxx, maxy, area, 0,0,0].
    Returns (bs, n_pad, HW_pad) IoU, float32.
    """
    bs, _, hw_pad = pred_flat.shape
    n_pad = gt_derived.shape[1]
    scale = float(scale)

    tile, per_col = _pick_hw_tile(hw_pad, n_pad, bs)
    footprint = per_col * tile + (n_pad * 128 * 4 * 2)    # + small gt block
    vmem_limit = int(min(max(2 * footprint + (2 << 20), 16 << 20), 32 << 20))

    def kernel(p_ref, r_ref, g_ref, o_ref):
        # --- decode: one fused op on the whole (4, tile) block --------------
        d = p_ref[...] * scale + r_ref[...]               # x0, y0, x1, y1 rows
        x0 = d[0:1]                                        # (1, tile)
        y0 = d[1:2]
        x1 = d[2:3]
        y1 = d[3:4]
        p_area = (x1 - x0) * (y1 - y0)                     # (1, tile)

        g = g_ref[...]                                     # (n_pad, 8)
        g_minx = g[:, 0:1]                                 # (n_pad, 1)
        g_miny = g[:, 1:2]
        g_maxx = g[:, 2:3]
        g_maxy = g[:, 3:4]
        g_area = g[:, 4:5]

        # Implicit (1,tile) x (n_pad,1) broadcasting folds into the VPU ops —
        # no materialized (n_pad, tile) temporaries beyond the live results.
        iw = jnp.maximum(jnp.minimum(x1, g_maxx) - jnp.maximum(x0, g_minx), 0.0)
        ih = jnp.maximum(jnp.minimum(y1, g_maxy) - jnp.maximum(y0, g_miny), 0.0)
        inter = iw * ih                                    # (n_pad, tile)
        union = p_area + g_area - inter
        # Exact divide: downstream dynamic-k ceil()/equality tie-breaks are
        # sensitive to last-ulp differences vs. the PyTorch reference.
        o_ref[...] = inter / jnp.maximum(union, 1e-6)

    grid = (bs, hw_pad // tile)
    return pl.pallas_call(
        kernel,
        out_shape=jax.ShapeDtypeStruct((bs, n_pad, hw_pad), jnp.float32),
        grid=grid,
        in_specs=[
            pl.BlockSpec((None, 4, tile), lambda b, t: (b, 0, t)),      # pred
            pl.BlockSpec((4, tile), lambda b, t: (0, t)),               # ref grid
            pl.BlockSpec((None, n_pad, 8), lambda b, t: (b, 0, 0)),     # gt derived
        ],
        out_specs=pl.BlockSpec((None, n_pad, tile), lambda b, t: (b, 0, t)),
        compiler_params=pltpu.CompilerParams(
            dimension_semantics=("parallel", "parallel"),
            vmem_limit_bytes=vmem_limit),
    )(pred_flat, ref_grid, gt_derived)


# ----------------------------------------------------------------------------
# Host-side helpers (verbatim port of the PyTorch/NumPy logic)
# ----------------------------------------------------------------------------
def min_max_ref_point_index(bbox, output_feature, model_input_size):
    min_x = bbox[0] - bbox[2] / 2
    min_y = bbox[1] - bbox[3] / 2
    max_x = bbox[0] + bbox[2] / 2
    max_y = bbox[1] + bbox[3] / 2
    min_wight_index = math.floor(max(min_x * output_feature[0] / model_input_size[0] - 1 / 2, 0))
    min_height_index = math.floor(max(min_y * output_feature[1] / model_input_size[1] - 1 / 2, 0))
    max_wight_index = math.ceil(min(max_x * output_feature[0] / model_input_size[0] - 1 / 2,
                                    output_feature[0] - 1))
    max_height_index = math.ceil(min(max_y * output_feature[1] / model_input_size[1] - 1 / 2,
                                     output_feature[1] - 1))
    return (min_wight_index, min_height_index, max_wight_index, max_height_index)


class GetTargetsPallas:
    def __init__(self, model_input_size, num_classes=2, scale=80.0, stride=2):
        self.model_input_size = model_input_size
        self.num_classes = num_classes
        self.scale = scale
        self.out_feature_size = [model_input_size[0] / stride, model_input_size[1] / stride]
        self.size_per_ref_point = model_input_size[0] / self.out_feature_size[0]

    def __call__(self, inputs, bboxes_bs):
        feat, pred = inputs                      # feat: (bs, C, H, W), pred: (bs, 4, H, W)
        bs, _, in_h, in_w = pred.shape
        out_w = int(self.out_feature_size[0])
        out_h = int(self.out_feature_size[1])
        HW = in_h * in_w
        HW_pad = int(math.ceil(HW / 128.0)) * 128   # lane-dense (unmasked vst) output

        # xyxy -> cxcywh on host (same in-place conversion as the reference);
        # keep the full rows (incl. class id / conf) for the assignment loop.
        boxes_host = []
        for b in range(bs):
            bb = np.array(bboxes_bs[b], dtype=np.float32).copy()
            if bb.shape[0] > 0:
                bb[:, 2] = bb[:, 2] - bb[:, 0]
                bb[:, 3] = bb[:, 3] - bb[:, 1]
                bb[:, 0] = bb[:, 0] + bb[:, 2] / 2
                bb[:, 1] = bb[:, 1] + bb[:, 3] / 2
            boxes_host.append(bb)

        max_n = max(int(b.shape[0]) for b in boxes_host) if bs > 0 else 0
        iou_all = None
        if max_n > 0:
            # Pad GT to a sublane-aligned N_pad so one batched pallas_call
            # serves the whole batch (no per-N recompile, no per-image launch).
            n_pad = max(8, int(math.ceil(max_n / 8.0)) * 8)

            # Precompute GT corners/areas (batch-only dependence) once on host.
            gt_derived = np.zeros((bs, n_pad, 8), dtype=np.float32)
            for b in range(bs):
                n = boxes_host[b].shape[0]
                if n:
                    g = boxes_host[b][:, :4]
                    gt_derived[b, :n, 0] = g[:, 0] - g[:, 2] * 0.5   # minx
                    gt_derived[b, :n, 1] = g[:, 1] - g[:, 3] * 0.5   # miny
                    gt_derived[b, :n, 2] = g[:, 0] + g[:, 2] * 0.5   # maxx
                    gt_derived[b, :n, 3] = g[:, 1] + g[:, 3] * 0.5   # maxy
                    gt_derived[b, :n, 4] = g[:, 2] * g[:, 3]         # area

            # Lane-dense (bs, 4, HW_pad) view of the raw predictions.
            pred_flat = jnp.reshape(jnp.asarray(pred, jnp.float32), (bs, 4, HW))
            if HW_pad != HW:
                pred_flat = jnp.pad(pred_flat, ((0, 0), (0, 0), (0, HW_pad - HW)))

            # Stacked reference-point grid [xs, ys, xs, ys] (built once on host).
            sx = float(self.model_input_size[0]) / in_w
            sy = float(self.model_input_size[1]) / in_h
            xs = np.arange(in_w, dtype=np.float32) * sx + sx * 0.5
            ys = np.arange(in_h, dtype=np.float32) * sy + sy * 0.5
            rx = np.broadcast_to(xs[None, :], (in_h, in_w)).reshape(-1)
            ry = np.broadcast_to(ys[:, None], (in_h, in_w)).reshape(-1)
            ref_grid = np.zeros((4, HW_pad), dtype=np.float32)
            ref_grid[0, :HW] = rx
            ref_grid[1, :HW] = ry
            ref_grid[2, :HW] = rx
            ref_grid[3, :HW] = ry

            iou_dev = _fused_decode_iou(pred_flat, jnp.asarray(ref_grid),
                                        jnp.asarray(gt_derived), self.scale)
            # Single device -> host transfer for the whole batch.
            iou_all = np.asarray(jax.device_get(iou_dev))

        targets_cls, targets_loc = [], []
        for b in range(bs):
            bb = boxes_host[b]
            if bb.shape[0] == 0:
                cls_map = np.array(([1.0] + [0.0] * (self.num_classes - 1)) * out_w * out_h,
                                   dtype=np.float32).reshape(1, out_h, out_w, -1)
                loc_map = np.ones(6 * out_w * out_h, dtype=np.float32).reshape(1, out_h, out_w, -1)
            else:
                iou_maps = iou_all[b, :bb.shape[0], :HW].reshape(-1, out_h, out_w)
                cls_map, loc_map = self._dynamic_label_assign(iou_maps, bb, out_w, out_h)
            targets_cls.append(cls_map)
            targets_loc.append(loc_map)

        targets_cls = jnp.asarray(np.concatenate(targets_cls, 0))
        targets_loc = jnp.asarray(np.concatenate(targets_loc, 0))
        return [targets_cls, targets_loc]

    # TODO(synk): dynamic-k selection + per-position python-dict arbitration is
    # data-dependent sequential host logic with no clean Pallas equivalent; it
    # stays in NumPy, consuming the Pallas IoU-kernel output.
    def _dynamic_label_assign(self, iou_maps, bboxes, out_w, out_h):
        num_classes = self.num_classes
        class_label_map = np.array(([1.0] + [0.0] * (num_classes - 1)) * out_w * out_h,
                                   dtype=np.float32)
        points_label_map = np.array([1.0] * 6 * out_w * out_h, dtype=np.float32)
        position_iou_value_dic = {}

        for n in range(bboxes.shape[0]):
            bbox = bboxes[n]
            obj_area = bbox[2] * bbox[3]
            if obj_area == 0:
                continue
            iou = iou_maps[n]  # (out_h, out_w)

            first_filter = np.zeros(out_w * out_h, dtype=np.float32)
            (min_wight_index, min_height_index,
             max_wight_index, max_height_index) = min_max_ref_point_index(
                bbox, (out_w, out_h), self.model_input_size)
            for i in range(min_height_index, max_height_index + 1):
                for j in range(min_wight_index, max_wight_index + 1):
                    first_filter[i * out_w + j] = 1
            first_filter = first_filter.reshape(out_h, out_w)

            iou_filter = iou * first_filter
            dynamic_k = np.sum(iou_filter)
            if dynamic_k < 1:
                dynamic_k = 1
            dynamic_k = math.ceil(dynamic_k)

            sorted_iou = np.sort(iou_filter.reshape(-1).copy())
            # TODO(synk): same threshold as the reference, with an out-of-range
            # guard (reference would raise if dynamic_k + 1 > out_h*out_w).
            thr_idx = min(dynamic_k + 1, sorted_iou.size)
            second_filter_index = iou_filter <= sorted_iou[-thr_idx]
            iou_filter = iou_filter.copy()
            iou_filter[second_filter_index] = 0
            lamda = (1 / dynamic_k) ** (1 / 2)

            for i in range(min_height_index, max_height_index + 1):
                for j in range(min_wight_index, max_wight_index + 1):
                    if iou_filter[i][j] > 0:
                        if (i, j) in position_iou_value_dic:
                            if iou_filter[i][j] < position_iou_value_dic[(i, j)]:
                                continue
                            elif iou_filter[i][j] == position_iou_value_dic[(i, j)]:
                                for c in range(num_classes):
                                    class_label_map[(i * out_w + j) * num_classes + c] = 0
                                continue
                            else:
                                position_iou_value_dic[(i, j)] = iou_filter[i][j]
                                for c in range(num_classes):
                                    class_label_map[(i * out_w + j) * num_classes + c] = 0
                        else:
                            position_iou_value_dic[(i, j)] = iou_filter[i][j]
                        class_label_map[(i * out_w + j) * num_classes + 0] = 0
                        class_label_map[(i * out_w + j) * num_classes + int(bbox[4]) + 1] = 1
                        points_label_map[(i * out_w + j) * 6 + 0] = bbox[0]
                        points_label_map[(i * out_w + j) * 6 + 1] = bbox[1]
                        points_label_map[(i * out_w + j) * 6 + 2] = bbox[2]
                        points_label_map[(i * out_w + j) * 6 + 3] = bbox[3]
                        points_label_map[(i * out_w + j) * 6 + 4] = bbox[5]
                        points_label_map[(i * out_w + j) * 6 + 5] = lamda
                    else:
                        class_label_map[(i * out_w + j) * num_classes + 0] = 0

        class_label_map = class_label_map.reshape(1, out_h, out_w, -1)
        points_label_map = points_label_map.reshape(1, out_h, out_w, -1)
        return class_label_map, points_label_map


# ----------------------------------------------------------------------------
if __name__ == "__main__":
    key = jax.random.PRNGKey(0)
    k1, k2 = jax.random.split(key)

    bs, C, H, W = 2, 4, 8, 8              # feature map 8x8 (= model_input 16 / stride 2)
    model_input_size = (16, 16)
    num_classes = 3                       # background slot + 2 object classes

    feat = jax.random.normal(k1, (bs, C, H, W), dtype=jnp.float32)           # input[0]
    pred = jax.random.normal(k2, (bs, 4, H, W), dtype=jnp.float32) * 0.01    # input[1]

    # GT boxes per image: [x1, y1, x2, y2, class_id, conf]
    bboxes_bs = [
        np.array([[2.0, 2.0, 8.0, 8.0, 0.0, 1.0],
                  [6.0, 5.0, 14.0, 12.0, 1.0, 1.0],
                  [1.0, 10.0, 5.0, 15.0, 0.0, 1.0]], dtype=np.float32),
        np.array([[3.0, 4.0, 10.0, 11.0, 1.0, 1.0],
                  [8.0, 1.0, 15.0, 7.0, 0.0, 1.0],
                  [0.0, 0.0, 6.0, 6.0, 1.0, 1.0]], dtype=np.float32),
    ]

    get_targets = GetTargetsPallas(model_input_size, num_classes=num_classes,
                                   scale=80.0, stride=2)
    targets = get_targets([feat, pred], bboxes_bs)

    targets_cls = jax.block_until_ready(targets[0])   # (bs, 8, 8, num_classes)
    targets_loc = jax.block_until_ready(targets[1])   # (bs, 8, 8, 6)

    assert targets_cls.shape == (bs, H, W, num_classes)
    assert targets_loc.shape == (bs, H, W, 6)
    assert bool(jnp.all(jnp.isfinite(targets_cls)))
    assert bool(jnp.all(jnp.isfinite(targets_loc)))
    print("KERNEL_OK")
</pallas_src>

<mosaic_0001>
module attributes {stable_mosaic.version = 11 : i64} {
  func.func @kernel(%arg0: i32, %arg1: i32, %arg2: memref<1x4x128xf32, #tpu.memory_space<vmem>>, %arg3: memref<4x128xf32, #tpu.memory_space<vmem>>, %arg4: memref<1x8x8xf32, #tpu.memory_space<vmem>>, %arg5: memref<1x8x128xf32, #tpu.memory_space<vmem>>) attributes {dimension_semantics = [#tpu.dimension_semantics<parallel>, #tpu.dimension_semantics<parallel>], iteration_bounds = array<i64: 2, 1>, scalar_prefetch = 0 : i64, scratch_operands = 0 : i64, tpu.core_type = #tpu.core_type<tc>, window_params = [{transform_indices = @transform_0, window_bounds = array<i64: 1, 4, 128>}, {transform_indices = @transform_1, window_bounds = array<i64: 4, 128>}, {transform_indices = @transform_2, window_bounds = array<i64: 1, 8, 8>}, {transform_indices = @transform_3, window_bounds = array<i64: 1, 8, 128>}]} {
    %c0 = arith.constant 0 : index
    %c0_0 = arith.constant 0 : index
    %c0_1 = arith.constant 0 : index
    %0 = vector.load %arg2[%c0, %c0_0, %c0_1] : memref<1x4x128xf32, #tpu.memory_space<vmem>>, vector<1x4x128xf32>
    %1 = vector.shape_cast %0 : vector<1x4x128xf32> to vector<4x128xf32>
    %cst = arith.constant 8.000000e+01 : f32
    %2 = vector.broadcast %cst : f32 to vector<4x128xf32>
    %3 = arith.mulf %1, %2 : vector<4x128xf32>
    %c0_2 = arith.constant 0 : index
    %c0_3 = arith.constant 0 : index
    %4 = vector.load %arg3[%c0_2, %c0_3] : memref<4x128xf32, #tpu.memory_space<vmem>>, vector<4x128xf32>
    %5 = arith.addf %3, %4 : vector<4x128xf32>
    %6 = vector.extract_strided_slice %5 {offsets = [0, 0], sizes = [1, 128], strides = [1, 1]} : vector<4x128xf32> to vector<1x128xf32>
    %7 = vector.extract_strided_slice %5 {offsets = [1, 0], sizes = [1, 128], strides = [1, 1]} : vector<4x128xf32> to vector<1x128xf32>
    %8 = vector.extract_strided_slice %5 {offsets = [2, 0], sizes = [1, 128], strides = [1, 1]} : vector<4x128xf32> to vector<1x128xf32>
    %9 = vector.extract_strided_slice %5 {offsets = [3, 0], sizes = [1, 128], strides = [1, 1]} : vector<4x128xf32> to vector<1x128xf32>
    %10 = arith.subf %8, %6 : vector<1x128xf32>
    %11 = arith.subf %9, %7 : vector<1x128xf32>
    %12 = arith.mulf %10, %11 : vector<1x128xf32>
    %c0_4 = arith.constant 0 : index
    %c0_5 = arith.constant 0 : index
    %c0_6 = arith.constant 0 : index
    %13 = vector.load %arg4[%c0_4, %c0_5, %c0_6] : memref<1x8x8xf32, #tpu.memory_space<vmem>>, vector<1x8x8xf32>
    %14 = vector.shape_cast %13 : vector<1x8x8xf32> to vector<8x8xf32>
    %15 = vector.extract_strided_slice %14 {offsets = [0, 0], sizes = [8, 1], strides = [1, 1]} : vector<8x8xf32> to vector<8x1xf32>
    %16 = vector.extract_strided_slice %14 {offsets = [0, 1], sizes = [8, 1], strides = [1, 1]} : vector<8x8xf32> to vector<8x1xf32>
    %17 = vector.extract_strided_slice %14 {offsets = [0, 2], sizes = [8, 1], strides = [1, 1]} : vector<8x8xf32> to vector<8x1xf32>
    %18 = vector.extract_strided_slice %14 {offsets = [0, 3], sizes = [8, 1], strides = [1, 1]} : vector<8x8xf32> to vector<8x1xf32>
    %19 = vector.extract_strided_slice %14 {offsets = [0, 4], sizes = [8, 1], strides = [1, 1]} : vector<8x8xf32> to vector<8x1xf32>
    %20 = vector.broadcast %8 : vector<1x128xf32> to vector<8x128xf32>
    %21 = vector.broadcast %17 : vector<8x1xf32> to vector<8x128xf32>
    %22 = arith.minimumf %20, %21 : vector<8x128xf32>
    %23 = vector.broadcast %6 : vector<1x128xf32> to vector<8x128xf32>
    %24 = vector.broadcast %15 : vector<8x1xf32> to vector<8x128xf32>
    %25 = arith.maximumf %23, %24 : vector<8x128xf32>
    %26 = arith.subf %22, %25 : vector<8x128xf32>
    %cst_7 = arith.constant 0.000000e+00 : f32
    %27 = vector.broadcast %cst_7 : f32 to vector<8x128xf32>
    %28 = arith.maximumf %26, %27 : vector<8x128xf32>
    %29 = vector.broadcast %9 : vector<1x128xf32> to vector<8x128xf32>
    %30 = vector.broadcast %18 : vector<8x1xf32> to vector<8x128xf32>
    %31 = arith.minimumf %29, %30 : vector<8x128xf32>
    %32 = vector.broadcast %7 : vector<1x128xf32> to vector<8x128xf32>
    %33 = vector.broadcast %16 : vector<8x1xf32> to vector<8x128xf32>
    %34 = arith.maximumf %32, %33 : vector<8x128xf32>
    %35 = arith.subf %31, %34 : vector<8x128xf32>
    %cst_8 = arith.constant 0.000000e+00 : f32
    %36 = vector.broadcast %cst_8 : f32 to vector<8x128xf32>
    %37 = arith.maximumf %35, %36 : vector<8x128xf32>
    %38 = arith.mulf %28, %37 : vector<8x128xf32>
    %39 = vector.broadcast %12 : vector<1x128xf32> to vector<8x128xf32>
    %40 = vector.broadcast %19 : vector<8x1xf32> to vector<8x128xf32>
    %41 = arith.addf %39, %40 : vector<8x128xf32>
    %42 = arith.subf %41, %38 : vector<8x128xf32>
    %cst_9 = arith.constant 9.99999997E-7 : f32
    %43 = vector.broadcast %cst_9 : f32 to vector<8x128xf32>
    %44 = arith.maximumf %42, %43 : vector<8x128xf32>
    %45 = arith.divf %38, %44 : vector<8x128xf32>
    %c0_10 = arith.constant 0 : index
    %c0_11 = arith.constant 0 : index
    %c0_12 = arith.constant 0 : index
    %46 = vector.load %arg5[%c0_10, %c0_11, %c0_12] : memref<1x8x128xf32, #tpu.memory_space<vmem>>, vector<1x8x128xf32>
    %47 = vector.shape_cast %46 : vector<1x8x128xf32> to vector<8x128xf32>
    %48 = vector.shape_cast %45 : vector<8x128xf32> to vector<1x8x128xf32>
    tpu.vector_store %arg5[%c0_10, %c0_11, %c0_12], %48 {strides = array<i32>} : memref<1x8x128xf32, #tpu.memory_space<vmem>>, vector<1x8x128xf32>,
    return
  }
  func.func @transform_0(%arg0: i32, %arg1: i32) -> (i32, i32, i32) {
    %c0_i32 = arith.constant 0 : i32
    %c0_i32_0 = arith.constant 0 : i32
    return %arg0, %c0_i32, %arg1 : i32, i32, i32
  }
  func.func @transform_1(%arg0: i32, %arg1: i32) -> (i32, i32) {
    %c0_i32 = arith.constant 0 : i32
    %c0_i32_0 = arith.constant 0 : i32
    return %c0_i32, %arg1 : i32, i32
  }
  func.func @transform_2(%arg0: i32, %arg1: i32) -> (i32, i32, i32) {
    %c0_i32 = arith.constant 0 : i32
    %c0_i32_0 = arith.constant 0 : i32
    %c0_i32_1 = arith.constant 0 : i32
    return %arg0, %c0_i32, %c0_i32_0 : i32, i32, i32
  }
  func.func @transform_3(%arg0: i32, %arg1: i32) -> (i32, i32, i32) {
    %c0_i32 = arith.constant 0 : i32
    %c0_i32_0 = arith.constant 0 : i32
    return %arg0, %c0_i32, %arg1 : i32, i32, i32
  }
}

</mosaic_0001>

<bundles_post_ra>
// kernel: tpu_custom_call.1
= control target key start
LH: loop header
LB: loop body
LE: loop exit
PB: predicated region body
PF: predicated region fallthrough
CT: control target
= control target key end

     0   :  { %8 = vsyncpa [#allocation3], 0  ;;  %s960_s0 = inlined_call_operand.hbm [shape: f32[2,4,128], index: 0, kind: input, shape index: {}]   ;;  %s961_s1 = inlined_call_operand.hbm [shape: f32[4,128], index: 1, kind: input, shape index: {}]   ;;  %s962_s2 = inlined_call_operand.hbm [shape: f32[2,8,8], index: 2, kind: input, shape index: {}]   ;;  %s963_s3 = inlined_call_operand.hbm [shape: f32[2,8,128], index: 3, kind: output, shape index: {}]  }
   0x1   :  { %10 = vsyncpa [#allocation3 + $0x1], 0 }
   0x2   :  { %11 = vsyncpa [#allocation6], 0 }
   0x3   :  { %12 = vsyncpa [#allocation4], 0 }
   0x4   :  { %14 = vsyncpa [#allocation4 + $0x1], 0  ;;  %s763_s12 = smov 0   ;;  %s765_s13 = smov 0  }
   0x5   :  { %s767_s14 = smov 0   ;;  %s769_s15 = smov 0  }
   0x6   :  { %s771_s16 = smov 0   ;;  %s773_s17 = smov 0  }
   0x7 LB: > { %s32_s18 = sadd.s32 1, %s728_s16  ;;  %s41_s19 = sadd.s32 1, %s720_s14  ;;  %s732_s17 = sphi %s773_s17, %s20_s17   ;;  %s728_s16 = sphi %s771_s16, %s983_s16   ;;  %s724_s15 = sphi %s769_s15, %s982_s15   ;;  %s720_s14 = sphi %s767_s14, %s981_s14   ;;  %s716_s13 = sphi %s765_s13, %s980_s13   ;;  %s712_s12 = sphi %s763_s12, %s979_s12  }
   0x8   : > { %p34_p0 = scmp.ge.s32.totalorder %s32_s18, 2  ;;  %p48_p1 = scmp.ne.s32.totalorder %s720_s14, %s716_s13 }
   0x9   : > { %p49_p2 = scmp.eq.s32.totalorder %s732_s17, 0  ;;  %p497_p5 = scmp.lt.s32.totalorder %s732_s17, 2 }
   0xa   : > { %s985_s18 = smov (%p34_p0, %s32_s18), 0  ;;  %s171_s21 = sand.u32 1, %s732_s17  }
   0xb   : > { %p50_p4 = por %p49_p2, %p48_p1  ;;  %s36_s20 = ssub.s32 %s728_s16, %s985_s18 }
   0xc   : > { %p39_p6 = scmp.eq.s32.totalorder %s36_s20, 0  ;;  %s173_s22 = sand.u32 1, %s720_s14  }
   0xd   : > { %s459_s23 = sshll.u32 %s728_s16, 6  ;;  %s458_s25 = sshll.u32 %s173_s22, 2 }
   0xe   : > { %s811_s24 = scalar_select %p39_p6, %s720_s14, %s41_s19  }
   0xf   : > { %s181_s28 = scalar_lea.hbm %s960_s0, %s459_s23  ;;  %p816_p7 = pnand %p497_p5, %p50_p4 }
  0x10   : > { %s175_s30 = scalar_lea.vmem [#allocation2], %s458_s25  ;;  %s820_s5 = sshll.u32 %s173_s22, 3 }
  0x11   : > { %s183_s4 = sshll.u32 %s175_s30, 4  ;;  %s822_s6 = scalar_lea.sflag [#allocation3], %s171_s21  ;;  %s184_s4 = int_to_ptr.vmem [resolvable:$true] %s183_s4 }
  0x12   : > { %p564_p8 = pneg %p816_p7  ;;  %s575_s7 = scalar_lea.vmem %s184_s4, 64 }
  0x13   : > { %p576_p9 = scmp.ne.s32.totalorder %s184_s4, %s575_s7  ;;  %s734_s8 = smov [#allocation2]  }
  0x14   : > { %s580_s9 = sshll.u32 %s734_s8, 4  ;;  %s581_s9 = int_to_ptr.vmem [resolvable:$false] %s580_s9 }
  0x15   : > { %p578_p10 = pnand %p576_p9, %p564_p8  ;;  %s582_s10 = scalar_lea.vmem %s581_s9, 128 }
  0x16   : > { %p583_p12 = scmp.lt.s32.totalorder %s184_s4, %s581_s9  ;;  %p584_p13 = scmp.lt.s32.totalorder %s582_s10, %s575_s7 }
  0x17   : > { %p579_p11 = pneg %p578_p10 }
  0x18   : > { %p585_p0 = por %p584_p13, %p583_p12 }
  0x1a   : > { %p586_p2 = pnand %p585_p0, %p579_p11 }
  0x1c   : > { %589 = shalt.err (!%p586_p2)
}
  0x1d   : > { %488 = dma.hbm_to_vmem [thread:$0]  (!%p816_p7), %s181_s28, 64, %s184_s4, %s822_s6  }
  0x1e   : > { %s833_s11 = sadd.s32 4294967295, %s732_s17   ;;  %s454_s19 = sadd.s32 4294967294, %s732_s17  }
  0x1f   : > { %p54_p4 = scmp.ne.s32.totalorder %s716_s13, %s712_s12  ;;  %p965_p5 = scmp.eq.s32.totalorder %s833_s11, 0 }
  0x20   : > { %p132_p6 = scmp.eq.s32.totalorder %s833_s11, 1  ;;  %p138_p9 = scmp.eq.s32.totalorder %s454_s19, 1 }
  0x21   : > { %p842_p10 = por %p965_p5, %p54_p4  ;;  %p455_p11 = scmp.ge.s32.totalorder %s732_s17, 1 }
  0x22   : > { %p850_p12 = por %p132_p6, %p48_p1  ;;  %p854_p13 = por %p138_p9, %p54_p4 }
  0x23   : > { %s968_s20 = scalar_select %p842_p10, 1, 0 }
  0x24   : > { %s969_s21 = scalar_select %p850_p12, 1, 0 }
  0x25   : > { %s970_s22 = scalar_select %p854_p13, 1, 0 }
  0x26   : > { %p145_p0 = scmp.lt.s32.totalorder %s732_s17, 3  ;;  %s735_s25 = smov [#allocation5]  }
  0x27   : > { %s160_s26 = sshll.u32 %s735_s25, 4  ;;  %s461_s27 = sshll.u32 %s728_s16, 7  ;;  %s869_s26 = int_to_ptr.vmem [resolvable:$true] %s160_s26 }
  0x28   : > { %p859_p2 = pnand %p455_p11, %p145_p0  ;;  %s199_s4 = scalar_lea.hbm %s962_s2, %s461_s27 }
  0x29   : > { %s194_s7 = scalar_lea.vmem [#allocation7], %s820_s5  ;;  %s736_s19 = smov [#allocation7]  }
  0x2a   : > { %p481_p3 = pneg %p859_p2  ;;  %s201_s8 = sshll.u32 %s194_s7, 4  ;;  %s202_s8 = int_to_ptr.vmem [resolvable:$true] %s201_s8 }
  0x2b   : > { %s603_s10 = scalar_lea.vmem %s202_s8, 128  ;;  %s608_s25 = sshll.u32 %s736_s19, 4  ;;  %s609_s25 = int_to_ptr.vmem [resolvable:$false] %s608_s25 }
  0x2c   : > { %p874_p1 = pnand %p481_p3, %p965_p5  ;;  %p604_p4 = scmp.ne.s32.totalorder %s202_s8, %s603_s10 }
  0x2d   : > { %s610_s27 = scalar_lea.vmem %s609_s25, 256  ;;  %p611_p11 = scmp.lt.s32.totalorder %s202_s8, %s609_s25 }
  0x2e   : > { %p606_p6 = pnand %p604_p4, %p564_p8  ;;  %p612_p0 = scmp.lt.s32.totalorder %s610_s27, %s603_s10 }
  0x30   : > { %p607_p9 = pneg %p606_p6  ;;  %p613_p13 = por %p612_p0, %p611_p11 }
  0x32   : > { %p614_p12 = pnand %p613_p13, %p607_p9 }
  0x34   : > { %617 = shalt.err (!%p614_p12)
}
  0x35   : > { %491 = dma.hbm_to_vmem [thread:$0]  (!%p816_p7), %s199_s4, 128, %s202_s8, %s822_s6  }
  0x36   : > { %p620_p3 = pneg %p874_p1  ;;  %s629_s5 = scalar_lea.vmem %s869_s26, 64 }
  0x37   : > { %p630_p8 = scmp.ne.s32.totalorder %s869_s26, %s629_s5  ;;  %p637_p5 = scmp.lt.s32.totalorder %s869_s26, %s869_s26 }
  0x38   : > { %p638_p10 = scmp.lt.s32.totalorder %s629_s5, %s629_s5 }
  0x39   : > { %p632_p4 = pnand %p630_p8, %p620_p3 }
  0x3a   : > { %p639_p11 = por %p638_p10, %p637_p5 }
  0x3b   : > { %p633_p6 = pneg %p632_p4 }
  0x3d   : > { %p640_p13 = pnand %p639_p11, %p633_p6 }
  0x3f   : > { %643 = shalt.err (!%p640_p13)
}
  0x40   : > { %484 = dma.hbm_to_vmem [thread:$0]  (!%p874_p1), %s961_s1, 64, %s869_s26, [#allocation6]  }
  0x41   : > { %210 = sbr.rel (%p859_p2) target bundleno = 249 (0xf9), region = 32  ;;  %s212_s6 = sand.u32 (!%p859_p2), 1, %s833_s11  }
  0x42   : > { %s900_s30 = sand.u32 (!%p859_p2), 1, %s716_s13   ;;  %s213_s7 = scalar_lea.sflag (!%p859_p2), [#allocation3], %s212_s6 }
  0x43   : > { %s463_s4 = sshll.u32 (!%p859_p2), %s900_s30, 2  ;;  %p973_p7 = scmp.ne.s32.totalorder (!%p859_p2), %s968_s20, 0 }
  0x44   : > { %s216_s8 = scalar_lea.vmem (!%p859_p2), [#allocation2], %s463_s4 }
  0x46   : > { %695 = dma.done.wait (%p973_p7), %s213_s7, 64  }
  0x47   : > { %697 = vsyncadd (%p973_p7), %s213_s7, 4294967232  ;;  %p974_p5 = scmp.eq.s32.totalorder %s833_s11, 0 }
  0x49   : > { %699 = dma.done.wait (%p974_p5), [#allocation6], 64   ;;  %p975_p10 = pmov %p974_p5 }
  0x4a   : > { %s465_s23 = sshll.u32 %s900_s30, 3 }
  0x4b   : > { %701 = vsyncadd (%p975_p10), [#allocation6], 4294967232  ;;  %s229_s26 = scalar_lea.vmem [#allocation7], %s465_s23 }
  0x4c   : > { %703 = dma.done.wait (%p973_p7), %s213_s7, 128  }
  0x4d   : > { %705 = vsyncadd (%p973_p7), %s213_s7, 4294967168  ;;  %v737_v0 = vmov 3   ;;  %v738_v1 = vmov 2   ;;  %v269_v2 = vld [vmem:[%s229_s26] sm:$0xff]  ;;  %v739_v3 = vmov 1   ;;  %v740_v4 = vmov 0  }
  0x4e   : > { %556 = vset.pattern.permute.xlu1 %v737_v0  ;;  %554 = vset.pattern.permute.xlu0 %v738_v1  ;;  %v741_v5 = vmov 4   ;;  %v257_v6 = vld [vmem:[%s216_s8] sm:$0xf]  ;;  %v259_v8 = vld [vmem:[#allocation5] sm:$0xf]  ;;  %v270_v10 = vlaneseq  ;;  %s468_s11 = sshll.u32 %s724_s15, 7 }
  0x4f   : > { %296 = vperm.xlu1 %556, %v269_v2   ;;  %276 = vperm.xlu0 %554, %v269_v2   ;;  %v258_v7 = vmul.f32 80.0, %v257_v6  ;;  %s256_s20 = scalar_lea.vmem [#allocation8], %s465_s23  ;;  %s339_s25 = scalar_lea.hbm %s963_s3, %s468_s11 }
  0x50   : > { %v271_v12 = vshrl.u32 %v270_v10, 7  ;;  %s341_s9 = sshll.u32 %s256_s20, 4  ;;  %s327_s27 = scalar_lea.sflag [#allocation4], %s900_s30  ;;  %s342_s9 = int_to_ptr.vmem [resolvable:$true] %s341_s9 }
  0x51   : > { %v260_v9 = vadd.f32 %v259_v8, %v258_v7  ;;  %s644_s5 = scalar_lea.vmem %s342_s9, 128  ;;  %p976_p2 = scmp.ne.s32.totalorder %s969_s21, 0 }
  0x52   : > { %v293_v14 = vsub.s32 3, %v271_v12  ;;  %v272_v15 = vsub.s32 2, %v271_v12  ;;  %v302_v16 = vsub.s32 1, %v271_v12  ;;  %v282_v17 = vsub.s32 0, %v271_v12  ;;  %p645_p12 = scmp.ne.s32.totalorder %s342_s9, %s644_s5  ;;  %s742_s29 = smov [#allocation8]  }
  0x53   : > { %557 = vset.pattern.permute.xlu1 %v739_v3  ;;  %555 = vset.pattern.permute.xlu0 %v740_v4  ;;  %v262_v11 = vrot.slane %v260_v9, 6  ;;  %s648_s28 = sshll.u32 %s742_s29, 4  ;;  %s649_s28 = int_to_ptr.vmem [resolvable:$false] %s648_s28 }
  0x54   : > { %305 = vperm.xlu1 %557, %v269_v2   ;;  %285 = vperm.xlu0 %555, %v269_v2   ;;  %v294_v21 = vrot.slane %v260_v9, %v293_v14  ;;  %v273_v22 = vrot.slane %v260_v9, %v272_v15  ;;  %v303_v23 = vrot.slane %v260_v9, %v302_v16  ;;  %p646_p1 = pnand %p645_p12, %p976_p2  ;;  %s650_s15 = scalar_lea.vmem %s649_s28, 256 }
  0x55   : > { %v264_v13 = vsub.f32 %v260_v9, %v262_v11  ;;  %v283_v24 = vrot.slane %v260_v9, %v282_v17  ;;  %p651_p0 = scmp.lt.s32.totalorder %s342_s9, %s649_s28  ;;  %p652_p3 = scmp.lt.s32.totalorder %s650_s15, %s644_s5 }
  0x56   : > { %p647_p9 = pneg %p646_p1 }
  0x57   : > { %v266_v18 = vrot.slane %v264_v13, 1  ;;  %p653_p8 = por %p652_p3, %p651_p0 }
  0x58   : > { %558 = vset.pattern.permute.xlu1 %v741_v5  ;;  %559 = vset.pattern.permute.xlu0 %v741_v5 }
  0x59   : > { %317 = vperm.xlu1 %558, %v269_v2   ;;  %v268_v25 = vmul.f32 %v266_v18, %v264_v13  ;;  %p654_p4 = pnand %p653_p8, %p647_p9 }
  0x5b   : > { %v315_v32 = vrot.slane %v268_v25, %v272_v15 }
  0xca   : > { %v297_v19 = vpop.permute.xlu1 %296  ;;  %v277_v20 = vpop.permute.xlu0 %276 }
  0xcb   : > { %v299_v28 = vmin.f32 %v294_v21, %v297_v19  ;;  %v279_v29 = vmin.f32 %v273_v22, %v277_v20 }
  0xcf   : > { %v306_v26 = vpop.permute.xlu1 %305  ;;  %v286_v27 = vpop.permute.xlu0 %285 }
  0xd0   : > { %v308_v30 = vmax.f32 %v303_v23, %v306_v26  ;;  %v288_v31 = vmax.f32 %v283_v24, %v286_v27 }
  0xd2   : > { %v309_v33 = vsub.f32 %v299_v28, %v308_v30  ;;  %v289_v34 = vsub.f32 %v279_v29, %v288_v31 }
  0xd4   : > { %v310_v35 = vmax.f32 %v309_v33, 0.0  ;;  %v290_v36 = vmax.f32 %v289_v34, 0.0  ;;  %v318_v37 = vpop.permute.xlu1 %317 }
  0xd5   : > { %v320_v38 = vadd.f32 %v318_v37, %v315_v32 }
  0xd6   : > { %v311_v39 = vmul.f32 %v310_v35, %v290_v36 }
  0xd8   : > { %v321_v40 = vsub.f32 %v320_v38, %v311_v39 }
  0xda   : > { %v322_v41 = vmax.f32 %v321_v40, 1e-06 }
  0xdc   : > { %560 = vrcp.f32 %v322_v41 }
  0xe9   : > { %v561_v42 = vpop.eup %560 }
  0xea   : > { %v324_v43 = vmul.f32 %v561_v42, %v311_v39 }
  0xec   : > { %325 = vst [vmem:[%s256_s20] sm:$0xff] %v324_v43 }
  0xed   : > { %657 = shalt.err (!%p654_p4)
}
  0xee   : > { %s658_s6 = scalar_lea.hbm %s339_s25, 128  ;;  %s662_s7 = scalar_lea.hbm %s963_s3, 256 }
  0xef   : > { %p659_p6 = scmp.ne.s32.totalorder %s339_s25, %s658_s6  ;;  %p663_p7 = scmp.lt.s32.totalorder %s339_s25, %s963_s3 }
  0xf0   : > { %p664_p5 = scmp.lt.s32.totalorder %s662_s7, %s658_s6 }
  0xf1   : > { %p660_p11 = pnand %p659_p6, %p976_p2 }
  0xf2   : > { %p665_p10 = por %p664_p5, %p663_p7 }
  0xf3   : > { %p661_p13 = pneg %p660_p11 }
  0xf5   : > { %p666_p12 = pnand %p665_p10, %p661_p13 }
  0xf7   : > { %669 = shalt.err (!%p666_p12)
}
  0xf8   : > { %479 = dma.vmem_to_hbm [thread:$0]  (%p976_p2), %s342_s9, 128, %s339_s25, %s327_s27  }
  0xf9 PF: > { %s353_s26 = sand.u32 1, %s712_s12   ;;  %p977_p1 = scmp.ne.s32.totalorder %s970_s22, 0 }
  0xfa   : > { %p978_p9 = scmp.ge.s32.totalorder %s732_s17, 2  ;;  %s354_s11 = scalar_lea.sflag [#allocation4], %s353_s26 }
  0xfc   : > { %p493_p0 = pnand %p978_p9, %p977_p1 }
  0xfe   : > { %p494_p3 = pneg %p493_p0 }
 0x100   : > { %707 = dma.done.wait (%p494_p3), %s354_s11, 128  }
 0x101   : > { %709 = vsyncadd (%p494_p3), %s354_s11, 4294967168  ;;  %s20_s17 = sadd.s32 1, %s732_s17   ;;  %s979_s12 = smov %s716_s13 }
 0x102   : > { %p17_p8 = scmp.ge.s32.totalorder %s20_s17, 4   ;;  %s980_s13 = smov %s720_s14 }
 0x103   : > { %s981_s14 = smov %s811_s24  ;;  %s982_s15 = smov %s728_s16 }
 0x104   : > { %s983_s16 = smov %s985_s18  ;;  %19 = sbr.rel (!%p17_p8) target bundleno = 7 (0x7), region = 93 }
 0x109   :  { %359 = vsyncpa [#allocation3], 1 }
 0x10a   :  { %361 = vsyncpa [#allocation3 + $0x1], 1 }
 0x10b   :  { %362 = vsyncpa [#allocation6], 1 }
 0x10c   :  { %363 = vsyncpa [#allocation4], 1 }
 0x10d   :  { %365 = vsyncpa [#allocation4 + $0x1], 1 }

</bundles_post_ra>
